<compile_context>
chip_gen: v5e
topology: v5e:2x2
jax: 0.10.0
libtpu: 0.0.40
codegen_flags: <defaults>
</compile_context>

<pallas_src>
import jax
import jax.numpy as jnp
from jax.experimental import pallas as pl
from jax.experimental.pallas import tpu as pltpu


# ---------------------------------------------------------------------------
# Pallas kernel: tiled identity copy over a 2-D (rows, cols) float32 slab.
# ---------------------------------------------------------------------------

def _copy_kernel(x_ref, o_ref):
    o_ref[...] = x_ref[...]


_TARGET_TILE_BYTES = 2 * 1024 * 1024  # 2 MiB tile; 2 in-bufs + 2 out-bufs
                                      # = 8 MiB VMEM, safe on v5e/v6e/v7x.


def _choose_block_rows(rows: int, cols: int, itemsize: int) -> int:
    """Sublane-aligned row-tile sized to ~_TARGET_TILE_BYTES (or full array)."""
    if rows <= 8:
        return rows  # full-extent block; (8,128) rule satisfied by "== dim".
    target_rows = max(8, _TARGET_TILE_BYTES // max(1, cols * itemsize))
    block = min(rows, target_rows)
    block = max(8, (block // 8) * 8)  # keep second-to-last dim 8-aligned
    return min(block, rows)


def _pallas_copy_2d(x: jax.Array, *, alias: bool) -> jax.Array:
    rows, cols = x.shape
    block_rows = _choose_block_rows(rows, cols, x.dtype.itemsize)
    grid = (pl.cdiv(rows, block_rows),)
    kwargs = dict(
        out_shape=jax.ShapeDtypeStruct((rows, cols), x.dtype),
        grid=grid,
        # Full-width (lane-dense) blocks; only the row axis is tiled.
        in_specs=[pl.BlockSpec((block_rows, cols), lambda i: (i, 0))],
        out_specs=pl.BlockSpec((block_rows, cols), lambda i: (i, 0)),
        compiler_params=pltpu.CompilerParams(
            dimension_semantics=("parallel",)),  # lets v7x use both TCs
    )
    if alias:
        kwargs["input_output_aliases"] = {0: 0}
    return pl.pallas_call(_copy_kernel, **kwargs)(x)


# ---------------------------------------------------------------------------
# JAX wrappers (jitted so the pallas operand on the complex path is an
# internal intermediate, making the input/output aliasing a real buffer reuse).
# ---------------------------------------------------------------------------

def _flatten_to_2d(x: jax.Array):
    shape = x.shape
    if x.ndim == 1:
        return x.reshape(1, shape[0]), shape
    if x.ndim == 2:
        return x, shape
    rows = 1
    for d in shape[:-1]:
        rows *= d
    return x.reshape(rows, shape[-1]), shape


@jax.jit
def _identity_complex(x: jax.Array) -> jax.Array:
    """Identity over a complex64 array, copied in-kernel as a float32 slab."""
    x2d, orig_shape = _flatten_to_2d(x)
    rows, units = x2d.shape
    # Interleave re/im along the last axis -> lane-dense (rows, 2*units) f32.
    interleaved = jnp.stack(
        [jnp.real(x2d), jnp.imag(x2d)], axis=-1).reshape(rows, 2 * units)
    out = _pallas_copy_2d(interleaved, alias=True)
    out = out.reshape(rows, units, 2)
    y = jax.lax.complex(out[..., 0], out[..., 1])
    return y.reshape(orig_shape)


@jax.jit
def _identity_real(x: jax.Array) -> jax.Array:
    """Identity over a float32 array (no fake imaginary channel)."""
    x2d, orig_shape = _flatten_to_2d(x)
    out = _pallas_copy_2d(x2d, alias=False)
    return out.reshape(orig_shape)


# ---------------------------------------------------------------------------
# Module
# ---------------------------------------------------------------------------

class TransformerLayer:
    """JAX/Pallas port of the PyTorch TransformerLayer base class."""

    def __init__(self, units: int, is_complex: bool = True,
                 is_trainable: bool = False):
        self.units = units
        self.is_complex = is_complex
        self.is_trainable = is_trainable
        # No parameters in the base class (transform is identity).

    def transform(self, inputs: jax.Array) -> jax.Array:
        if self.is_complex:
            return _identity_complex(inputs.astype(jnp.complex64))
        return _identity_real(inputs.astype(jnp.float32))

    def inverse_transform(self, outputs: jax.Array) -> jax.Array:
        return self.transform(outputs)

    @property
    def matrix(self):
        eye = jnp.eye(self.units, dtype=jnp.complex64)
        return self.transform(eye)

    @property
    def inverse_matrix(self):
        eye = jnp.eye(self.units, dtype=jnp.complex64)
        return self.inverse_transform(eye)

    # TODO(synk): plot() (matplotlib host-side visualization) has no Pallas
    # equivalent and is omitted.

    def __call__(self, x: jax.Array) -> jax.Array:
        return self.transform(x)


if __name__ == "__main__":
    units = 32
    batch = 8

    key = jax.random.PRNGKey(0)
    kr, ki = jax.random.split(key)
    x_real = jax.random.normal(kr, (batch, units), dtype=jnp.float32)
    x_imag = jax.random.normal(ki, (batch, units), dtype=jnp.float32)
    x = jax.lax.complex(x_real, x_imag)  # (batch, units) complex64

    # Complex path.
    layer = TransformerLayer(units=units, is_complex=True, is_trainable=False)
    y = jax.block_until_ready(layer(x))
    assert y.shape == x.shape, (y.shape, x.shape)
    assert y.dtype == jnp.complex64, y.dtype
    assert bool(jnp.allclose(y, x)), "identity transform mismatch (complex)"

    # `matrix` property (transform of the identity matrix).
    m = jax.block_until_ready(layer.matrix)
    assert bool(jnp.allclose(m, jnp.eye(units, dtype=jnp.complex64)))

    # Real-valued path (no zero imaginary channel).
    layer_r = TransformerLayer(units=units, is_complex=False)
    yr = jax.block_until_ready(layer_r(x_real))
    assert yr.shape == x_real.shape and yr.dtype == jnp.float32
    assert bool(jnp.allclose(yr, x_real)), "identity transform mismatch (real)"

    print("KERNEL_OK")
</pallas_src>

<mosaic_0001>
module attributes {stable_mosaic.version = 11 : i64} {
  func.func @_copy_kernel(%arg0: i32, %arg1: memref<8x64xf32, #tpu.memory_space<vmem>>, %arg2: memref<8x64xf32, #tpu.memory_space<vmem>>) attributes {dimension_semantics = [#tpu.dimension_semantics<parallel>], iteration_bounds = array<i64: 1>, scalar_prefetch = 0 : i64, scratch_operands = 0 : i64, tpu.core_type = #tpu.core_type<tc>, window_params = [{transform_indices = @transform_0, window_bounds = array<i64: 8, 64>}, {transform_indices = @transform_1, window_bounds = array<i64: 8, 64>}]} {
    %c0 = arith.constant 0 : index
    %c0_0 = arith.constant 0 : index
    %0 = vector.load %arg1[%c0, %c0_0] : memref<8x64xf32, #tpu.memory_space<vmem>>, vector<8x64xf32>
    %c0_1 = arith.constant 0 : index
    %c0_2 = arith.constant 0 : index
    %1 = vector.load %arg2[%c0_1, %c0_2] : memref<8x64xf32, #tpu.memory_space<vmem>>, vector<8x64xf32>
    tpu.vector_store %arg2[%c0_1, %c0_2], %0 {strides = array<i32>} : memref<8x64xf32, #tpu.memory_space<vmem>>, vector<8x64xf32>,
    return
  }
  func.func @transform_0(%arg0: i32) -> (i32, i32) {
    %c0_i32 = arith.constant 0 : i32
    %c0_i32_0 = arith.constant 0 : i32
    return %arg0, %c0_i32 : i32, i32
  }
  func.func @transform_1(%arg0: i32) -> (i32, i32) {
    %c0_i32 = arith.constant 0 : i32
    %c0_i32_0 = arith.constant 0 : i32
    return %arg0, %c0_i32 : i32, i32
  }
}

</mosaic_0001>

<bundles_post_ra>
// kernel: custom-call
= control target key start
LH: loop header
LB: loop body
LE: loop exit
PB: predicated region body
PF: predicated region fallthrough
CT: control target
= control target key end

     0   :  { %2 = vsyncpa [#allocation0], 0  ;;  %s55_s0 = inlined_call_operand.hbm [shape: c64[8,32], index: 0, kind: input, shape index: {}]   ;;  %s56_s1 = inlined_call_operand.vmem [shape: f32[8,32], index: 1, kind: output, shape index: {}]  }
   0x1   :  { %s4_s8 = sshll.u32 %s55_s0, 4  ;;  %s6_s11 = sshll.u32 %s56_s1, 4  ;;  %s5_s8 = int_to_ptr.hbm [resolvable:$true] %s4_s8  ;;  %s7_s11 = int_to_ptr.vmem [resolvable:$true] %s6_s11 }
   0x2   :  { %9 = dma.hbm_to_vmem [thread:$0]  %s5_s8, 128, %s7_s11, [#allocation0] }
   0x3   :  { %37 = dma.done.wait [#allocation0], 128  }
   0x4   :  { %38 = vsyncadd [#allocation0], 4294967168 }
   0x5   :  { %12 = vsyncpa [#allocation0], 1 }

// kernel: custom-call.1
= control target key start
LH: loop header
LB: loop body
LE: loop exit
PB: predicated region body
PF: predicated region fallthrough
CT: control target
= control target key end

     0   :  { %s56_s0 = inlined_call_operand.hbm [shape: c64[8,32], index: 0, kind: input, shape index: {}]   ;;  %s57_s1 = inlined_call_operand.vmem [shape: f32[8,32], index: 1, kind: output, shape index: {}]  }
   0x1   :  { %s2_s8 = scalar_lea.hbm %s56_s0, 8 }
   0x2   :  { %3 = vsyncpa [#allocation0], 0  ;;  %s5_s9 = sshll.u32 %s2_s8, 4  ;;  %s7_s12 = sshll.u32 %s57_s1, 4  ;;  %s6_s9 = int_to_ptr.hbm [resolvable:$true] %s5_s9  ;;  %s8_s12 = int_to_ptr.vmem [resolvable:$true] %s7_s12 }
   0x3   :  { %10 = dma.hbm_to_vmem [thread:$0]  %s6_s9, 128, %s8_s12, [#allocation0] }
   0x4   :  { %38 = dma.done.wait [#allocation0], 128  }
   0x5   :  { %39 = vsyncadd [#allocation0], 4294967168 }
   0x6   :  { %13 = vsyncpa [#allocation0], 1 }

// kernel: custom-call.2
= control target key start
LH: loop header
LB: loop body
LE: loop exit
PB: predicated region body
PF: predicated region fallthrough
CT: control target
= control target key end

     0   :  { %s111_s0 = inlined_call_operand.vmem [shape: f32[8,32], index: 0, kind: input, shape index: {}]   ;;  %s112_s1 = inlined_call_operand.vmem [shape: f32[8,32], index: 1, kind: input, shape index: {}]   ;;  %s113_s2 = inlined_call_operand.vmem [shape: c64[8,32], index: 2, kind: output, shape index: {}]  }
   0x1   :  { %v4_v0 = vld [vmem:[%s111_s0] sm:$0xff]  ;;  %v35_v1 = vld [vmem:[%s111_s0 + $0x8] sm:$0xff]  ;;  %v37_v2 = vld [vmem:[%s111_s0 + $0x10] sm:$0xff] }
   0x2   :  { %5 = vst [vmem:[%s113_s2] sm:$0xff] %v4_v0  ;;  %v39_v3 = vld [vmem:[%s111_s0 + $0x18] sm:$0xff]  ;;  %v18_v4 = vld [vmem:[%s112_s1] sm:$0xff]  ;;  %v42_v5 = vld [vmem:[%s112_s1 + $0x8] sm:$0xff] }
   0x3   :  { %36 = vst [vmem:[%s113_s2 + $0x8] sm:$0xff] %v35_v1  ;;  %v44_v6 = vld [vmem:[%s112_s1 + $0x10] sm:$0xff]  ;;  %v46_v7 = vld [vmem:[%s112_s1 + $0x18] sm:$0xff] }
   0x4   :  { %38 = vst [vmem:[%s113_s2 + $0x10] sm:$0xff] %v37_v2 }
   0x5   :  { %40 = vst [vmem:[%s113_s2 + $0x18] sm:$0xff] %v39_v3 }
   0x6   :  { %41 = vst [vmem:[%s113_s2 + $0x20] sm:$0xff] %v18_v4 }
   0x7   :  { %43 = vst [vmem:[%s113_s2 + $0x28] sm:$0xff] %v42_v5 }
   0x8   :  { %45 = vst [vmem:[%s113_s2 + $0x30] sm:$0xff] %v44_v6 }
   0x9   :  { %47 = vst [vmem:[%s113_s2 + $0x38] sm:$0xff] %v46_v7 }

// kernel: _identity_complex.1
= control target key start
LH: loop header
LB: loop body
LE: loop exit
PB: predicated region body
PF: predicated region fallthrough
CT: control target
= control target key end

     0   :  { %vm9_vm0 = vcmask 523264   ;;  %s31_s0 = inlined_call_operand.vmem [shape: f32[8,64], index: 0, kind: input, shape index: {}, may-alias: {0,1}]   ;;  %s32_s1 = inlined_call_operand.vmem [shape: f32[8,64], index: 1, kind: output, shape index: {}, may-alias: {0,1}]  }
   0x1   :  { %v8_v0 = vld [vmem:[%s31_s0] sm:$0xff] }
   0x2   :  { %10 = vst.msk [vmem:[%s32_s1] sm:$0xff] %vm9_vm0, %v8_v0 }

</bundles_post_ra>
